<compile_context>
chip_gen: v7x
topology: tpu7x:2x2x1
jax: 0.10.0
libtpu: 0.0.40
codegen_flags: <defaults>
</compile_context>

<pallas_src>
import jax
import jax.numpy as jnp
from jax.experimental import pallas as pl
from jax.experimental.pallas import tpu as pltpu

_FAN_IN = 28 * 28   # 784
_N_OUT = 10
_TM_MAX = 1024      # rows per batch tile (f32 x tile: 3.2 MiB, double-buffered)


def _linear_kernel(x_ref, wt_ref, b_ref, o_ref):
    # x_ref: (TM, 784) f32 — cast to bf16 here (no separate HBM cast pass),
    # wt_ref: (784, 10) bf16 (VMEM-resident), b_ref: (1, 10) f32.
    x_bf16 = x_ref[...].astype(jnp.bfloat16)
    acc = jnp.dot(x_bf16, wt_ref[...], preferred_element_type=jnp.float32)
    o_ref[...] = (acc + b_ref[...]).astype(o_ref.dtype)


def _round_up(n, m):
    return ((n + m - 1) // m) * m


def _pick_tm(B):
    # Small batches: one full-extent block (block dims == array dims, always legal).
    if B <= 256:
        return B
    # Larger batches: guarantee >= 2 grid steps so v7x megacore can shard the
    # "parallel" batch axis across both TensorCores; round the tile to 256 rows
    # and cap it so the double-buffered f32 x tile stays a few MiB of VMEM.
    half = -(-B // 2)
    return min(_TM_MAX, _round_up(half, 256))


def logistic_regression_forward(x, weight, bias):
    """x: (B, 1, 28, 28) or (B, 784) f32. weight: (10, 784), bias: (10,) (PyTorch layout)."""
    x2d = x.reshape(-1, _FAN_IN)   # same as torch .view(-1, 784); stays f32, no pad/cast pass
    B = x2d.shape[0]

    tm = _pick_tm(B)
    grid = (pl.cdiv(B, tm),)       # trailing partial block is masked by Pallas

    # Weight/bias are tiny and VMEM-resident; casting W to bf16 here is ~31 KB of traffic.
    wt_bf16 = weight.T.astype(jnp.bfloat16)            # (784, 10)
    b2d = bias.reshape(1, _N_OUT).astype(jnp.float32)  # (1, 10)

    cost = pl.CostEstimate(
        flops=2 * B * _FAN_IN * _N_OUT,
        transcendentals=0,
        bytes_accessed=(B * _FAN_IN * 4          # x read (f32)
                        + B * _N_OUT * 4         # output write (f32)
                        + _FAN_IN * _N_OUT * 2   # weight (bf16)
                        + _N_OUT * 4),           # bias
    )

    out = pl.pallas_call(
        _linear_kernel,
        out_shape=jax.ShapeDtypeStruct((B, _N_OUT), jnp.float32),
        grid=grid,
        in_specs=[
            pl.BlockSpec((tm, _FAN_IN), lambda i: (i, 0)),      # x tile, auto double-buffered
            pl.BlockSpec((_FAN_IN, _N_OUT), lambda i: (0, 0)),  # weight, resident
            pl.BlockSpec((1, _N_OUT), lambda i: (0, 0)),        # bias, resident
        ],
        out_specs=pl.BlockSpec((tm, _N_OUT), lambda i: (i, 0)),
        compiler_params=pltpu.CompilerParams(
            dimension_semantics=("parallel",),
        ),
        cost_estimate=cost,
    )(x2d, wt_bf16, b2d)

    return out


def init_params(key):
    # Deterministic init mimicking nn.Linear default: U(-1/sqrt(fan_in), 1/sqrt(fan_in))
    k_w, k_b = jax.random.split(key)
    bound = 1.0 / jnp.sqrt(jnp.float32(_FAN_IN))
    weight = jax.random.uniform(k_w, (_N_OUT, _FAN_IN), jnp.float32, -bound, bound)
    bias = jax.random.uniform(k_b, (_N_OUT,), jnp.float32, -bound, bound)
    return weight, bias


if __name__ == "__main__":
    key = jax.random.PRNGKey(0)
    k_x, k_p = jax.random.split(key)

    batch = 2
    x = jax.random.normal(k_x, (batch, 1, 28, 28), jnp.float32)  # NCHW, like PyTorch MNIST
    weight, bias = init_params(k_p)

    out = logistic_regression_forward(x, weight, bias)
    out = jax.block_until_ready(out)

    assert out.shape == (batch, _N_OUT)

    # Tight check against a bf16-input / f32-accumulate reference (matches kernel math).
    x2d = x.reshape(-1, _FAN_IN)
    ref_bf16 = (
        jnp.dot(x2d.astype(jnp.bfloat16), weight.T.astype(jnp.bfloat16),
                preferred_element_type=jnp.float32)
        + bias.reshape(1, _N_OUT)
    )
    assert jnp.allclose(out, ref_bf16, atol=1e-5, rtol=1e-5)

    # Loose check against the full-f32 PyTorch-equivalent reference.
    ref_f32 = x2d @ weight.T + bias
    assert jnp.allclose(out, ref_f32, atol=5e-2, rtol=5e-2)

    print("KERNEL_OK")
</pallas_src>

<mosaic_0001>
module attributes {stable_mosaic.version = 11 : i64} {
  func.func @_linear_kernel(%arg0: i32, %arg1: memref<2x784xf32, #tpu.memory_space<vmem>>, %arg2: memref<784x10xbf16, #tpu.memory_space<vmem>>, %arg3: memref<1x10xf32, #tpu.memory_space<vmem>>, %arg4: memref<2x10xf32, #tpu.memory_space<vmem>>) attributes {dimension_semantics = [#tpu.dimension_semantics<parallel>], iteration_bounds = array<i64: 1>, scalar_prefetch = 0 : i64, scratch_operands = 0 : i64, tpu.core_type = #tpu.core_type<tc>, window_params = [{transform_indices = @transform_0, window_bounds = array<i64: 2, 784>}, {pipeline_mode = #tpu.pipeline_mode<synchronous>, transform_indices = @transform_1, window_bounds = array<i64: 784, 10>}, {pipeline_mode = #tpu.pipeline_mode<synchronous>, transform_indices = @transform_2, window_bounds = array<i64: 1, 10>}, {transform_indices = @transform_3, window_bounds = array<i64: 2, 10>}]} {
    %c0 = arith.constant 0 : index
    %c0_0 = arith.constant 0 : index
    %0 = vector.load %arg1[%c0, %c0_0] : memref<2x784xf32, #tpu.memory_space<vmem>>, vector<2x784xf32>
    %1 = arith.truncf %0 : vector<2x784xf32> to vector<2x784xbf16>
    %c0_1 = arith.constant 0 : index
    %c0_2 = arith.constant 0 : index
    %2 = vector.load %arg2[%c0_1, %c0_2] : memref<784x10xbf16, #tpu.memory_space<vmem>>, vector<784x10xbf16>
    %cst = arith.constant dense<0.000000e+00> : vector<2x10xf32>
    %3 = tpu.matmul %1, %2, %cst {dimension_numbers = #tpu.dot_dimension_numbers<[1], [0], [0], [1], [0, 0, 1, 1], [], []>} : vector<2x784xbf16>, vector<784x10xbf16>, vector<2x10xf32> -> vector<2x10xf32>
    %c0_3 = arith.constant 0 : index
    %c0_4 = arith.constant 0 : index
    %4 = vector.load %arg3[%c0_3, %c0_4] : memref<1x10xf32, #tpu.memory_space<vmem>>, vector<1x10xf32>
    %5 = vector.broadcast %4 : vector<1x10xf32> to vector<2x10xf32>
    %6 = arith.addf %3, %5 : vector<2x10xf32>
    %c0_5 = arith.constant 0 : index
    %c0_6 = arith.constant 0 : index
    %7 = vector.load %arg4[%c0_5, %c0_6] : memref<2x10xf32, #tpu.memory_space<vmem>>, vector<2x10xf32>
    tpu.vector_store %arg4[%c0_5, %c0_6], %6 {strides = array<i32>} : memref<2x10xf32, #tpu.memory_space<vmem>>, vector<2x10xf32>,
    return
  }
  func.func @transform_0(%arg0: i32) -> (i32, i32) {
    %c0_i32 = arith.constant 0 : i32
    %c0_i32_0 = arith.constant 0 : i32
    return %arg0, %c0_i32 : i32, i32
  }
  func.func @transform_1(%arg0: i32) -> (i32, i32) {
    %c0_i32 = arith.constant 0 : i32
    %c0_i32_0 = arith.constant 0 : i32
    %c0_i32_1 = arith.constant 0 : i32
    return %c0_i32, %c0_i32_0 : i32, i32
  }
  func.func @transform_2(%arg0: i32) -> (i32, i32) {
    %c0_i32 = arith.constant 0 : i32
    %c0_i32_0 = arith.constant 0 : i32
    %c0_i32_1 = arith.constant 0 : i32
    return %c0_i32, %c0_i32_0 : i32, i32
  }
  func.func @transform_3(%arg0: i32) -> (i32, i32) {
    %c0_i32 = arith.constant 0 : i32
    %c0_i32_0 = arith.constant 0 : i32
    return %arg0, %c0_i32 : i32, i32
  }
}

</mosaic_0001>

<bundles_post_ra>
// kernel: tpu_custom_call.1
= control target key start
LH: loop header
LB: loop body
LE: loop exit
PB: predicated region body
PF: predicated region fallthrough
CT: control target
= control target key end

     0   :  { %v24_v27 = vlaneseq  ;;  %v850_v35 = vmov 1983009808   ;;  %v851_v40 = vmov 0.0   ;;  %vm852_vm0 = vmmov 0   ;;  %s1042_s0 = inlined_call_operand.vmem [shape: f32[2,784], index: 0, kind: input, shape index: {}]   ;;  %s1043_s1 = inlined_call_operand.vmem [shape: bf16[784,10], index: 1, kind: input, shape index: {}]   ;;  %s1044_s2 = inlined_call_operand.vmem [shape: f32[1,10], index: 2, kind: input, shape index: {}]   ;;  %s1045_s3 = inlined_call_operand.hbm [shape: f32[2,10], index: 3, kind: output, shape index: {}]  }
   0x1   :  { %v775_v0 = vld [vmem:[%s1043_s1 + $0x40] sm:$0xff]   ;;  %v779_v4 = vld [vmem:[%s1043_s1 + $0x48] sm:$0xff]   ;;  %v783_v8 = vld [vmem:[%s1043_s1 + $0x50] sm:$0xff]   ;;  %v22_v36 = vunpack.c.l.s4 %v850_v35 }
   0x2   :  { %v776_v1 = vld [vmem:[%s1043_s1] sm:$0xff]   ;;  %697 = vmatprep.subr.bf16.mxu0 %v775_v0  ;;  %v780_v5 = vld [vmem:[%s1043_s1 + $0x8] sm:$0xff]   ;;  %v784_v9 = vld [vmem:[%s1043_s1 + $0x10] sm:$0xff]   ;;  %v25_v32 = vshrl.u32 %v24_v27, 7 }
   0x3   :  { %v777_v2 = vld [vmem:[%s1043_s1 + $0xc0] sm:$0xff]   ;;  %698 = vmatpush3.bf16.msra.mxu0 %v776_v1  ;;  %v781_v6 = vld [vmem:[%s1043_s1 + $0xc8] sm:$0xff]   ;;  %v785_v10 = vld [vmem:[%s1043_s1 + $0xd0] sm:$0xff]   ;;  %v23_v38 = vunpack.c.0.s8 %v22_v36 }
   0x4   :  { %v778_v3 = vld [vmem:[%s1043_s1 + $0x80] sm:$0xff]   ;;  %719 = vmatprep.subr.bf16.mxu1 %v777_v2  ;;  %699 = vmatprep.subr.bf16.mxu0 %v779_v4  ;;  %v782_v7 = vld [vmem:[%s1043_s1 + $0x88] sm:$0xff]   ;;  %v786_v11 = vld [vmem:[%s1043_s1 + $0x90] sm:$0xff]  }
   0x5   :  { %720 = vmatpush3.bf16.msra.mxu1 %v778_v3  ;;  %v787_v12 = vld [vmem:[%s1043_s1 + $0x58] sm:$0xff]   ;;  %v791_v16 = vld [vmem:[%s1043_s1 + $0x60] sm:$0xff]   ;;  %v795_v20 = vld [vmem:[%s1043_s1 + $0x68] sm:$0xff]   ;;  %v26_v41 = vsub.s32 %v23_v38, %v25_v32 }
   0x6   :  { %721 = vmatprep.subr.bf16.mxu1 %v781_v6  ;;  %v788_v13 = vld [vmem:[%s1043_s1 + $0x18] sm:$0xff]   ;;  %v792_v17 = vld [vmem:[%s1043_s1 + $0x20] sm:$0xff]   ;;  %v796_v21 = vld [vmem:[%s1043_s1 + $0x28] sm:$0xff]  }
   0x7   :  { %700 = vmatpush3.bf16.msra.mxu0 %v780_v5  ;;  %v789_v14 = vld [vmem:[%s1043_s1 + $0xd8] sm:$0xff]   ;;  %v793_v18 = vld [vmem:[%s1043_s1 + $0xe0] sm:$0xff]   ;;  %v797_v22 = vld [vmem:[%s1043_s1 + $0xe8] sm:$0xff]  }
   0x8   :  { %701 = vmatprep.subr.bf16.mxu0 %v783_v8  ;;  %v790_v15 = vld [vmem:[%s1043_s1 + $0x98] sm:$0xff]   ;;  %v794_v19 = vld [vmem:[%s1043_s1 + $0xa0] sm:$0xff]   ;;  %v798_v23 = vld [vmem:[%s1043_s1 + $0xa8] sm:$0xff]  }
   0x9   :  { %722 = vmatpush3.bf16.msra.mxu1 %v782_v7  ;;  %v799_v24 = vld [vmem:[%s1043_s1 + $0x70] sm:$0xff]   ;;  %v803_v29 = vld [vmem:[%s1043_s1 + $0x78] sm:$0xff]   ;;  %v16_v33 = vld [vmem:[%s1042_s0] sm:$0xff] }
   0xa   :  { %723 = vmatprep.subr.bf16.mxu1 %v785_v10  ;;  %v800_v25 = vld [vmem:[%s1043_s1 + $0x30] sm:$0xff]   ;;  %v804_v30 = vld [vmem:[%s1043_s1 + $0x38] sm:$0xff]   ;;  %v807_v37 = vld [vmem:[%s1043_s1 + $0x140] sm:$0xff]   ;;  %v20_v39 = vcombine.high %v16_v33, %v16_v33  ;;  %v27_v42 = vrot.slane %v16_v33, %v26_v41 }
   0xb   :  { %702 = vmatpush3.bf16.msra.mxu0 %v784_v9  ;;  %v801_v26 = vld [vmem:[%s1043_s1 + $0xf0] sm:$0xff]   ;;  %v805_v31 = vld [vmem:[%s1043_s1 + $0xf8] sm:$0xff]   ;;  %v809_v50 = vld [vmem:[%s1043_s1 + $0x100] sm:$0xff]  }
   0xc   :  { %703 = vmatprep.subr.bf16.mxu0 %v787_v12  ;;  %v802_v28 = vld [vmem:[%s1043_s1 + $0xb0] sm:$0xff]   ;;  %v806_v34 = vld [vmem:[%s1043_s1 + $0xb8] sm:$0xff]   ;;  %v34_v43 = vrot.slane %v20_v39, %v26_v41  ;;  %v35_v44 = vcombine.high %v27_v42, %v27_v42  ;;  %v60_v46 = vpack.c.bf16 %v27_v42, %v27_v42  ;;  %v810_v51 = vld [vmem:[%s1043_s1 + $0x148] sm:$0xff]  }
   0xd   :  { %724 = vmatpush3.bf16.msra.mxu1 %v786_v11  ;;  %v811_v52 = vld [vmem:[%s1043_s1 + $0x108] sm:$0xff]   ;;  %v812_v53 = vld [vmem:[%s1043_s1 + $0x150] sm:$0xff]   ;;  %v824_v54 = vld [vmem:[%s1043_s1 + $0x180] sm:$0xff]  }
   0xe   :  { %725 = vmatprep.subr.bf16.mxu1 %v789_v14  ;;  %v36_v45 = vcombine.high %v34_v43, %v34_v43  ;;  %v62_v47 = vpack.c.bf16 %v34_v43, %v34_v43  ;;  %v61_v48 = vpack.c.bf16 %v35_v44, %v35_v44  ;;  %v17_v55 = vld [vmem:[%s1042_s0 + $0x8] sm:$0x3f] }
   0xf   :  { %704 = vmatpush3.bf16.msra.mxu0 %v788_v13 }
  0x10   :  { %705 = vmatprep.subr.bf16.mxu0 %v791_v16  ;;  %v63_v49 = vpack.c.bf16 %v36_v45, %v36_v45  ;;  %502 = vmatprep.mubr.bf16.mxu0 %v61_v48 }
  0x11   :  { %726 = vmatpush3.bf16.msra.mxu1 %v790_v15 }
  0x12   :  { %727 = vmatprep.subr.bf16.mxu1 %v793_v18  ;;  %542 = vmatprep.mubr.bf16.mxu1 %v63_v49 }
  0x13   :  { %706 = vmatpush3.bf16.msra.mxu0 %v792_v17 }
  0x14   :  { %707 = vmatprep.subr.bf16.mxu0 %v795_v20 }
  0x15   :  { %728 = vmatpush3.bf16.msra.mxu1 %v794_v19 }
  0x16   :  { %729 = vmatprep.subr.bf16.mxu1 %v797_v22 }
  0x17   :  { %708 = vmatpush3.bf16.msra.mxu0 %v796_v21 }
  0x18   :  { %709 = vmatprep.subr.bf16.mxu0 %v799_v24 }
  0x19   :  { %730 = vmatpush3.bf16.msra.mxu1 %v798_v23 }
  0x1a   :  { %731 = vmatprep.subr.bf16.mxu1 %v801_v26 }
  0x1b   :  { %710 = vmatpush3.bf16.msra.mxu0 %v800_v25 }
  0x1c   :  { %711 = vmatprep.subr.bf16.mxu0 %v803_v29 }
  0x1d   :  { %732 = vmatpush3.bf16.msra.mxu1 %v802_v28 }
  0x1e   :  { %733 = vmatprep.subr.bf16.mxu1 %v805_v31 }
  0x1f   :  { %712 = vmatpush3.bf16.msra.mxu0 %v804_v30 }
  0x20   :  { %741 = vmatprep.subr.bf16.mxu0 %v807_v37 }
  0x21   :  { %734 = vmatpush3.bf16.msra.mxu1 %v806_v34 }
  0x22   :  { %765 = vmatprep.subr.bf16.mxu1 %v851_v40  ;;  %503 = vmatmul.mubr.bf16.vlgmr.msra.gmra.mrb[0].mxu0 %v60_v46 }
  0x23   :  { %742 = vmatpush3.bf16.msra.mxu0 %v809_v50 }
  0x24   :  { %543 = vmatmul.mubr.bf16.vlgmr.msra.gmra.mrb[0].mxu1 %v62_v47  ;;  %743 = vmatprep.subr.bf16.mxu0 %v810_v51 }
  0x25   :  { %767 = vmatprep.mubr.msk.bf16.mxu1 %vm852_vm0, %v851_v40 }
  0x26   :  { %8 = vsyncpa [#allocation3], 0  ;;  %v813_v56 = vld [vmem:[%s1043_s1 + $0x110] sm:$0xff]   ;;  %v37_v57 = vcombine.high %v17_v55, %v17_v55  ;;  %v44_v58 = vrot.slane %v17_v55, %v26_v41  ;;  %v814_v59 = vld [vmem:[%s1043_s1 + $0x158] sm:$0xff]   ;;  %766 = vmatpush3.bf16.msra.mxu1 %v824_v54  ;;  %vm466_vm1 = vcmask 130048   ;;  %vm630_vm2 = vcmask 74752  }
  0x27   :  { %744 = vmatpush3.bf16.msra.mxu0 %v811_v52  ;;  %v815_v62 = vld [vmem:[%s1043_s1 + $0x118] sm:$0xff]   ;;  %v816_v1 = vld [vmem:[%s1043_s1 + $0x160] sm:$0xff]   ;;  %v818_v3 = vld [vmem:[%s1043_s1 + $0x168] sm:$0xff]  }
  0x28   :  { %745 = vmatprep.subr.bf16.mxu0 %v812_v53  ;;  %v51_v60 = vrot.slane %v37_v57, %v26_v41  ;;  %v52_v61 = vcombine.high %v44_v58, %v44_v58  ;;  %v817_v2 = vld [vmem:[%s1043_s1 + $0x120] sm:$0xff]   ;;  %v819_v4 = vld [vmem:[%s1043_s1 + $0x128] sm:$0xff]   ;;  %v820_v5 = vld [vmem:[%s1043_s1 + $0x170] sm:$0xff]   ;;  %v64_v9 = vpack.c.bf16 %v44_v58, %v44_v58 }
  0x29   :  { %v821_v6 = vld [vmem:[%s1043_s1 + $0x130] sm:$0xff]   ;;  %v822_v7 = vld [vmem:[%s1043_s1 + $0x178] sm:$0xff]   ;;  %v646_v12 = vld [vmem:[%s1044_s2] ss:$0 sm:$0xff] }
  0x2a   :  { %v65_v63 = vpack.c.bf16 %v52_v61, %v52_v61  ;;  %v66_v0 = vpack.c.bf16 %v51_v60, %v51_v60  ;;  %v823_v8 = vld [vmem:[%s1043_s1 + $0x138] sm:$0xff]   ;;  %s853_s1 = smov [#allocation2]  }
  0x2b   :  { %746 = vmatpush3.bf16.msra.mxu0 %v813_v56  ;;  %s638_s2 = sshll.u32 %s853_s1, 4  ;;  %s639_s2 = int_to_ptr.vmem [resolvable:$true] %s638_s2 }
  0x2c   :  { %747 = vmatprep.subr.bf16.mxu0 %v814_v59  ;;  %582 = vmatprep.mubr.bf16.mxu0 %v65_v63  ;;  %s826_s7 = scalar_lea.vmem %s639_s2, 32  ;;  %p831_p1 = scmp.lt.s32.totalorder %s639_s2, %s639_s2 }
  0x2d   :  { %768 = vmatmul.mubr.msk.bf16.vlgmr.msra.gmra.mrb[4].mxu1 %vm466_vm1, %v66_v0  ;;  %p827_p0 = scmp.ne.s32.totalorder %s639_s2, %s826_s7  ;;  %p832_p2 = scmp.lt.s32.totalorder %s826_s7, %s826_s7 }
  0x2f   :  { %748 = vmatpush3.bf16.msra.mxu0 %v815_v62  ;;  %p833_p3 = por %p832_p2, %p831_p1 }
  0x30   :  { %749 = vmatprep.subr.bf16.mxu0 %v816_v1 }
  0x31   :  { %p834_p4 = pnand %p833_p3, %p827_p0 }
  0x33   :  { %750 = vmatpush3.bf16.msra.mxu0 %v817_v2 }
  0x34   :  { %751 = vmatprep.subr.bf16.mxu0 %v818_v3 }
  0x37   :  { %752 = vmatpush3.bf16.msra.mxu0 %v819_v4 }
  0x38   :  { %753 = vmatprep.subr.bf16.mxu0 %v820_v5 }
  0x3b   :  { %754 = vmatpush3.bf16.msra.mxu0 %v821_v6 }
  0x3c   :  { %755 = vmatprep.subr.bf16.mxu0 %v822_v7 }
  0x3f   :  { %756 = vmatpush3.bf16.msra.mxu0 %v823_v8 }
  0x42   :  { %583 = vmatmul.mubr.bf16.vlgmr.msra.gmra.mrb[4].mxu0 %v64_v9 }
  0xf5   :  { %v713_v10 = vpop.f32.mrb[0].mxu0 }
  0xf6   :  { %v714_v13 = vpop.f32.mrb[1].mxu0 }
  0xf7   :  { %v735_v11 = vpop.f32.mrb[0].mxu1  ;;  %v715_v15 = vadd.f32 %v714_v13, %v713_v10  ;;  %v716_v16 = vpop.f32.mrb[2].mxu0 }
  0xf8   :  { %v736_v14 = vpop.f32.mrb[1].mxu1  ;;  %v717_v19 = vpop.f32.mrb[3].mxu0 }
  0xf9   :  { %v737_v17 = vadd.f32 %v736_v14, %v735_v11  ;;  %v738_v18 = vpop.f32.mrb[2].mxu1  ;;  %v505_v21 = vadd.f32 %v715_v15, %v646_v12 }
  0xfa   :  { %v739_v20 = vpop.f32.mrb[3].mxu1 }
  0xfb   :  { %v545_v22 = vadd.f32 %v737_v17, %v505_v21 }
 0x100   :  { %v624_v23 = vpop.f32.mrb[4].mxu1 }
 0x101   :  { %v769_v24 = vpop.f32.mrb[5].mxu1 }
 0x102   :  { %v627_v25 = vpop.f32.mrb[6].mxu1 }
 0x103   :  { %v770_v26 = vpop.f32.mrb[7].mxu1 }
 0x115   :  { %v757_v27 = vpop.f32.mrb[4].mxu0 }
 0x116   :  { %v758_v28 = vpop.f32.mrb[5].mxu0 }
 0x117   :  { %v759_v29 = vadd.f32 %v758_v28, %v757_v27  ;;  %v760_v30 = vpop.f32.mrb[6].mxu0 }
 0x118   :  { %v761_v31 = vpop.f32.mrb[7].mxu0 }
 0x119   :  { %v585_v32 = vadd.f32 %v759_v29, %v545_v22 }
 0x11b   :  { %v625_v33 = vadd.f32 %v624_v23, %v585_v32 }
 0x11d   :  { %631 = vst.msk [vmem:[#allocation2] sm:$0x3] %vm630_vm2, %v625_v33 }
 0x11e   :  { %837 = shalt.err (!%p834_p4)
}
 0x11f   :  { %s838_s10 = scalar_lea.hbm %s1045_s3, 32 }
 0x120   :  { %p839_p5 = scmp.ne.s32.totalorder %s1045_s3, %s838_s10  ;;  %p842_p6 = scmp.lt.u32.totalorder %s838_s10, %s1045_s3 }
 0x122   :  { %p844_p7 = pnand %p842_p6, %p839_p5 }
 0x124   :  { %847 = shalt.err (!%p844_p7)
}
 0x125   :  { %641 = dma.vmem_to_hbm [thread:$0]  %s639_s2, 32, %s1045_s3, [#allocation3]  }
 0x126   :  { %848 = dma.done.wait [#allocation3], 32  }
 0x127   :  { %849 = vsyncadd [#allocation3], 4294967264 }
 0x128   :  { %645 = vsyncpa [#allocation3], 1 }

</bundles_post_ra>
